<compile_context>
chip_gen: v5e
topology: v5e:2x2
jax: 0.10.0
libtpu: 0.0.40
codegen_flags: <defaults>
</compile_context>

<pallas_src>
import functools

import jax
import jax.numpy as jnp
from jax import lax
from jax.experimental import pallas as pl
from jax.experimental.pallas import tpu as pltpu


_LANES = 128
_SUBLANES = 8
_MAX_BLOCK_ROWS = 2048     # 2048 x 128 f32 = 1 MiB per input per block
_N_SPLITS = 2              # leading "parallel" grid axis (both TCs on v7x)


def _sse_kernel(x_ref, y_ref, o_ref, *, rows, block_rows, blocks_per_split,
                needs_mask):
    """Accumulate per-lane partial sums of (x - y)^2 into this split's
    resident (8, 128) output block."""
    c = pl.program_id(0)   # split index        ("parallel")
    i = pl.program_id(1)   # block within split ("arbitrary" / reduction axis)

    @pl.when(i == 0)
    def _():
        o_ref[...] = jnp.zeros_like(o_ref)

    d = x_ref[...].astype(jnp.float32) - y_ref[...].astype(jnp.float32)

    if needs_mask:
        # Zero rows past the end of the real data (overhanging last block or
        # phantom blocks of the split). Pure VPU compare+select.
        g = c * blocks_per_split + i            # logical (unclamped) block id
        row_ids = g * block_rows + lax.broadcasted_iota(
            jnp.int32, (block_rows, 1), 0)
        d = jnp.where(row_ids < rows, d, 0.0)

    sq = d * d
    # Reduce only along the leading tile-of-8-rows axis: elementwise vreg adds
    # on the VPU; no cross-lane / XLU work in the hot loop.
    o_ref[...] += jnp.sum(
        sq.reshape(block_rows // _SUBLANES, _SUBLANES, _LANES), axis=0)


def _sum_squared_error(inputs: jax.Array, targets: jax.Array) -> jax.Array:
    """Pallas-computed sum((inputs - targets)^2) over all elements (f32)."""
    assert inputs.shape == targets.shape, "RMSELoss requires matching shapes"

    x = inputs.reshape(-1)
    y = targets.reshape(-1)
    n = x.shape[0]

    tile = _SUBLANES * _LANES  # 1024 elements = one (8, 128) f32 tile
    if n % tile != 0:
        # Rare misaligned fallback: one extra HBM copy of the inputs. Padded
        # zeros contribute (0 - 0)^2 = 0, so the result stays exact.
        pad = tile - n % tile
        x = jnp.pad(x, (0, pad))
        y = jnp.pad(y, (0, pad))

    rows = x.shape[0] // _LANES               # multiple of 8
    x2d = x.reshape(rows, _LANES)             # zero-copy reshape
    y2d = y.reshape(rows, _LANES)

    block_rows = min(_MAX_BLOCK_ROWS, rows)   # multiple of 8
    n_blocks = -(-rows // block_rows)
    blocks_per_split = -(-n_blocks // _N_SPLITS)
    needs_mask = _N_SPLITS * blocks_per_split * block_rows > rows

    def in_map(c, i):
        # Clamp phantom / overhanging block ids so the DMA stays in bounds;
        # the kernel masks the corresponding rows to zero.
        return (jnp.minimum(c * blocks_per_split + i, n_blocks - 1), 0)

    kernel = functools.partial(
        _sse_kernel, rows=rows, block_rows=block_rows,
        blocks_per_split=blocks_per_split, needs_mask=needs_mask)

    bytes_in = 2 * rows * _LANES * x2d.dtype.itemsize
    partials = pl.pallas_call(
        kernel,
        out_shape=jax.ShapeDtypeStruct((_N_SPLITS * _SUBLANES, _LANES),
                                       jnp.float32),
        grid_spec=pltpu.PrefetchScalarGridSpec(
            num_scalar_prefetch=0,
            grid=(_N_SPLITS, blocks_per_split),
            in_specs=[
                pl.BlockSpec((block_rows, _LANES), in_map),
                pl.BlockSpec((block_rows, _LANES), in_map),
            ],
            out_specs=pl.BlockSpec((_SUBLANES, _LANES), lambda c, i: (c, 0)),
        ),
        compiler_params=pltpu.CompilerParams(
            dimension_semantics=("parallel", "arbitrary"),
        ),
        cost_estimate=pl.CostEstimate(
            flops=3 * n,
            transcendentals=0,
            bytes_accessed=bytes_in + _N_SPLITS * _SUBLANES * _LANES * 4,
        ),
    )(x2d, y2d)

    # Single cross-lane reduction of the per-split per-lane partials (tiny).
    return jnp.sum(partials, dtype=jnp.float32)


def rmse_loss(inputs: jax.Array,
              targets: jax.Array,
              reduction: str = "mean",
              eps: float = 1e-6) -> jax.Array:
    """JAX/Pallas equivalent of mammal.losses.RMSELoss.forward."""
    if reduction == "mean":
        sse = _sum_squared_error(inputs, targets)
        return jnp.sqrt(sse / jnp.float32(inputs.size) + jnp.float32(eps))
    elif reduction == "sum":
        sse = _sum_squared_error(inputs, targets)
        return jnp.sqrt(sse + jnp.float32(eps))
    else:
        # TODO(synk): reduction='none' (elementwise sqrt((x-y)^2 + eps)) not
        # implemented in the Pallas path; only 'mean'/'sum' are supported.
        raise NotImplementedError(f"reduction={reduction!r} not supported")


if __name__ == "__main__":
    key = jax.random.PRNGKey(0)
    k1, k2 = jax.random.split(key)

    # Small NCHW-like example (batch=2, channels=4, spatial=16x16).
    shape = (2, 4, 16, 16)
    inputs = jax.random.normal(k1, shape, dtype=jnp.float32)
    targets = jax.random.normal(k2, shape, dtype=jnp.float32)

    loss = rmse_loss(inputs, targets)
    loss = jax.block_until_ready(loss)

    # Reference check in plain JAX.
    ref = jnp.sqrt(jnp.mean((inputs - targets) ** 2) + 1e-6)
    assert jnp.allclose(loss, ref, rtol=1e-5, atol=1e-6), (loss, ref)

    print("KERNEL_OK")
</pallas_src>

<mosaic_0001>
module attributes {stable_mosaic.version = 11 : i64} {
  func.func @_sse_kernel(%arg0: i32, %arg1: i32, %arg2: memref<16x128xf32, #tpu.memory_space<vmem>>, %arg3: memref<16x128xf32, #tpu.memory_space<vmem>>, %arg4: memref<8x128xf32, #tpu.memory_space<vmem>>) attributes {dimension_semantics = [#tpu.dimension_semantics<parallel>, #tpu.dimension_semantics<arbitrary>], iteration_bounds = array<i64: 2, 1>, scalar_prefetch = 0 : i64, scratch_operands = 0 : i64, tpu.core_type = #tpu.core_type<tc>, window_params = [{transform_indices = @transform_0, window_bounds = array<i64: 16, 128>}, {transform_indices = @transform_1, window_bounds = array<i64: 16, 128>}, {transform_indices = @transform_2, window_bounds = array<i64: 8, 128>}]} {
    %c0_i32 = arith.constant 0 : i32
    %0 = arith.cmpi eq, %arg1, %c0_i32 : i32
    %1 = arith.extui %0 : i1 to i32
    %c0_i32_0 = arith.constant 0 : i32
    %2 = arith.cmpi ne, %1, %c0_i32_0 : i32
    scf.if %2 {
      %cst_10 = arith.constant 0.000000e+00 : f32
      %24 = vector.broadcast %cst_10 : f32 to vector<8x128xf32>
      %c0_11 = arith.constant 0 : index
      %c0_12 = arith.constant 0 : index
      %25 = vector.load %arg4[%c0_11, %c0_12] : memref<8x128xf32, #tpu.memory_space<vmem>>, vector<8x128xf32>
      tpu.vector_store %arg4[%c0_11, %c0_12], %24 {strides = array<i32>} : memref<8x128xf32, #tpu.memory_space<vmem>>, vector<8x128xf32>,
    } else {
    }
    %c0 = arith.constant 0 : index
    %c0_1 = arith.constant 0 : index
    %3 = vector.load %arg2[%c0, %c0_1] : memref<16x128xf32, #tpu.memory_space<vmem>>, vector<16x128xf32>
    %c0_2 = arith.constant 0 : index
    %c0_3 = arith.constant 0 : index
    %4 = vector.load %arg3[%c0_2, %c0_3] : memref<16x128xf32, #tpu.memory_space<vmem>>, vector<16x128xf32>
    %5 = arith.subf %3, %4 : vector<16x128xf32>
    %c1_i32 = arith.constant 1 : i32
    %6 = arith.muli %arg0, %c1_i32 : i32
    %7 = arith.addi %6, %arg1 : i32
    %c16_i32 = arith.constant 16 : i32
    %8 = arith.muli %7, %c16_i32 : i32
    %9 = tpu.iota {dimensions = array<i32: 0>} : vector<16x1xi32>
    %10 = vector.broadcast %8 : i32 to vector<16x1xi32>
    %11 = arith.addi %10, %9 : vector<16x1xi32>
    %c16_i32_4 = arith.constant 16 : i32
    %12 = vector.broadcast %c16_i32_4 : i32 to vector<16x1xi32>
    %13 = arith.cmpi slt, %11, %12 : vector<16x1xi32>
    %cst = arith.constant 0.000000e+00 : f32
    %14 = vector.shape_cast %13 : vector<16x1xi1> to vector<16x1xi1>
    %15 = vector.broadcast %14 : vector<16x1xi1> to vector<16x128xi1>
    %16 = vector.broadcast %cst : f32 to vector<16x128xf32>
    %17 = arith.select %15, %5, %16 : vector<16x128xi1>, vector<16x128xf32>
    %18 = arith.mulf %17, %17 : vector<16x128xf32>
    %c0_5 = arith.constant 0 : index
    %c0_6 = arith.constant 0 : index
    %19 = vector.load %arg4[%c0_5, %c0_6] : memref<8x128xf32, #tpu.memory_space<vmem>>, vector<8x128xf32>
    %20 = vector.shape_cast %18 : vector<16x128xf32> to vector<2x8x128xf32>
    %cst_7 = arith.constant dense<0.000000e+00> : vector<8x128xf32>
    %21 = vector.multi_reduction <add>, %20, %cst_7 [0] : vector<2x8x128xf32> to vector<8x128xf32>
    %22 = arith.addf %19, %21 : vector<8x128xf32>
    %c0_8 = arith.constant 0 : index
    %c0_9 = arith.constant 0 : index
    %23 = vector.load %arg4[%c0_8, %c0_9] : memref<8x128xf32, #tpu.memory_space<vmem>>, vector<8x128xf32>
    tpu.vector_store %arg4[%c0_8, %c0_9], %22 {strides = array<i32>} : memref<8x128xf32, #tpu.memory_space<vmem>>, vector<8x128xf32>,
    return
  }
  func.func @transform_0(%arg0: i32, %arg1: i32) -> (i32, i32) {
    %c1_i32 = arith.constant 1 : i32
    %0 = arith.muli %arg0, %c1_i32 : i32
    %1 = arith.addi %0, %arg1 : i32
    %c0_i32 = arith.constant 0 : i32
    %2 = arith.minsi %1, %c0_i32 : i32
    %c0_i32_0 = arith.constant 0 : i32
    %c0_i32_1 = arith.constant 0 : i32
    return %2, %c0_i32_0 : i32, i32
  }
  func.func @transform_1(%arg0: i32, %arg1: i32) -> (i32, i32) {
    %c1_i32 = arith.constant 1 : i32
    %0 = arith.muli %arg0, %c1_i32 : i32
    %1 = arith.addi %0, %arg1 : i32
    %c0_i32 = arith.constant 0 : i32
    %2 = arith.minsi %1, %c0_i32 : i32
    %c0_i32_0 = arith.constant 0 : i32
    %c0_i32_1 = arith.constant 0 : i32
    return %2, %c0_i32_0 : i32, i32
  }
  func.func @transform_2(%arg0: i32, %arg1: i32) -> (i32, i32) {
    %c0_i32 = arith.constant 0 : i32
    %c0_i32_0 = arith.constant 0 : i32
    return %arg0, %c0_i32 : i32, i32
  }
}

</mosaic_0001>

<bundles_post_ra>
// kernel: tpu_custom_call.1
= control target key start
LH: loop header
LB: loop body
LE: loop exit
PB: predicated region body
PF: predicated region fallthrough
CT: control target
= control target key end

     0   :  { %7 = vsyncpa [#allocation3], 0  ;;  %s866_s0 = inlined_call_operand.hbm [shape: f32[16,128], index: 0, kind: input, shape index: {}]   ;;  %s867_s1 = inlined_call_operand.hbm [shape: f32[16,128], index: 1, kind: input, shape index: {}]   ;;  %s868_s2 = inlined_call_operand.hbm [shape: f32[16,128], index: 2, kind: output, shape index: {}]  }
   0x1   :  { %9 = vsyncpa [#allocation3 + $0x1], 0 }
   0x2   :  { %10 = vsyncpa [#allocation6], 0 }
   0x3   :  { %12 = vsyncpa [#allocation6 + $0x1], 0 }
   0x4   :  { %13 = vsyncpa [#allocation4], 0 }
   0x5   :  { %15 = vsyncpa [#allocation4 + $0x1], 0  ;;  %s697_s9 = smov 0   ;;  %s699_s10 = smov 0  }
   0x6   :  { %s701_s11 = smov 0   ;;  %s703_s12 = smov 0  }
   0x7   :  { %s705_s13 = smov 0   ;;  %s707_s14 = smov 0  }
   0x8   :  { %s709_s15 = smov 0   ;;  %s711_s16 = smov 0  }
   0x9 LB: > { %s394_s17 = sadd.s32 4294967295, %s676_s16   ;;  %s395_s18 = sadd.s32 4294967294, %s676_s16   ;;  %s676_s16 = sphi %s711_s16, %s21_s16   ;;  %s672_s15 = sphi %s709_s15, %s880_s15   ;;  %s668_s14 = sphi %s707_s14, %s879_s14   ;;  %s664_s13 = sphi %s705_s13, %s856_s13   ;;  %s660_s12 = sphi %s703_s12, %s878_s12   ;;  %s656_s11 = sphi %s701_s11, %s877_s11   ;;  %s652_s10 = sphi %s699_s10, %s876_s10   ;;  %s648_s9 = sphi %s697_s9, %s875_s9  }
   0xa   : > { %s33_s19 = sadd.s32 1, %s672_s15  ;;  %p645_p1 = scmp.ne.s32.totalorder %s664_s13, 0 }
   0xb   : > { %p35_p0 = scmp.ge.s32.totalorder %s33_s19, 2  ;;  %p54_p2 = scmp.eq.s32.totalorder %s676_s16, 0 }
   0xc   : > { %p59_p3 = scmp.ne.s32.totalorder %s664_s13, %s660_s12  ;;  %p60_p5 = scmp.eq.s32.totalorder %s394_s17, 0 }
   0xd   : > { %s882_s19 = smov (%p35_p0, %s33_s19), 0  ;;  %p743_p4 = por %p645_p1, %p54_p2 }
   0xe   : > { %p747_p6 = por %p60_p5, %p59_p3  ;;  %s101_s22 = ssub.s32 %s672_s15, %s882_s19 }
   0xf   : > { %p102_p7 = scmp.eq.s32.totalorder %s101_s22, 0  ;;  %s104_s23 = sadd.s32 1, %s656_s11 }
  0x10   : > { %p114_p8 = scmp.ne.s32.totalorder %s656_s11, %s652_s10  ;;  %p115_p9 = scmp.eq.s32.totalorder %s394_s17, 1 }
  0x11   : > { %s755_s24 = scalar_select %p102_p7, %s656_s11, %s104_s23  }
  0x12   : > { %p120_p10 = scmp.ne.s32.totalorder %s652_s10, %s648_s9  ;;  %p121_p11 = scmp.eq.s32.totalorder %s395_s18, 1 }
  0x13   : > { %p761_p12 = por %p115_p9, %p114_p8  ;;  %p397_p13 = scmp.ge.s32.totalorder %s676_s16, 2 }
  0x14   : > { %p766_p0 = por %p121_p11, %p120_p10  ;;  %p432_p1 = scmp.lt.s32.totalorder %s676_s16, 2 }
  0x15   : > { %s154_s29 = sshll.u32 %s866_s0, 4  ;;  %s678_s30 = smov [#allocation2]   ;;  %s155_s29 = int_to_ptr.hbm [resolvable:$true] %s154_s29 }
  0x16   : > { %s156_s3 = sshll.u32 %s678_s30, 4  ;;  %p776_p2 = pnand %p432_p1, %p743_p4  ;;  %s157_s3 = int_to_ptr.vmem [resolvable:$true] %s156_s3 }
  0x17   : > { %p404_p3 = scmp.ge.s32.totalorder %s676_s16, 1  ;;  %p189_p5 = scmp.lt.s32.totalorder %s676_s16, 3 }
  0x18   : > { %s509_s5 = sshra.s32 %s155_s29, 4  ;;  %p513_p8 = pneg %p776_p2  ;;  %s510_s5 = int_to_ptr.hbm [resolvable:$true] %s509_s5 }
  0x19   : > { %s511_s6 = scalar_lea.hbm %s510_s5, 16  ;;  %s516_s12 = scalar_lea.hbm %s866_s0, 16 }
  0x1a   : > { %p512_p7 = scmp.ne.s32.totalorder %s510_s5, %s511_s6  ;;  %p518_p4 = scmp.lt.s32.totalorder %s516_s12, %s511_s6 }
  0x1c   : > { %p514_p9 = pnand %p513_p8, %p512_p7 }
  0x1e   : > { %p515_p10 = pneg %p514_p9 }
  0x20   : > { %p520_p11 = pnand %p518_p4, %p515_p10 }
  0x22   : > { %523 = shalt.err (!%p520_p11)
}
  0x23   : > { %s679_s17 = smov 128   ;;  %s680_s18 = smov 8  }
  0x24   : > { %424 = dma.hbm_to_vmem [thread:$0]  (!%p776_p2), %s155_s29, 256, %s157_s3, [#allocation3], %s679_s17, %s679_s17, %s680_s18  }
  0x25   : > { %p796_p1 = pnand %p404_p3, %p189_p5  ;;  %s179_s27 = sshll.u32 %s867_s1, 4  ;;  %s180_s27 = int_to_ptr.hbm [resolvable:$true] %s179_s27 }
  0x26   : > { %s681_s28 = smov [#allocation5]   ;;  %s539_s5 = sshra.s32 %s180_s27, 4  ;;  %s540_s5 = int_to_ptr.hbm [resolvable:$true] %s539_s5 }
  0x27   : > { %s181_s30 = sshll.u32 %s681_s28, 4  ;;  %s541_s6 = scalar_lea.hbm %s540_s5, 16  ;;  %s182_s30 = int_to_ptr.vmem [resolvable:$true] %s181_s30 }
  0x28   : > { %p542_p7 = scmp.ne.s32.totalorder %s540_s5, %s541_s6  ;;  %s546_s7 = scalar_lea.hbm %s867_s1, 16 }
  0x29   : > { %p548_p3 = scmp.lt.s32.totalorder %s546_s7, %s541_s6 }
  0x2a   : > { %p544_p9 = pnand %p542_p7, %p513_p8 }
  0x2c   : > { %p545_p10 = pneg %p544_p9 }
  0x2e   : > { %p550_p5 = pnand %p548_p3, %p545_p10 }
  0x30   : > { %553 = shalt.err (!%p550_p5)
}
  0x31   : > { %427 = dma.hbm_to_vmem [thread:$0]  (!%p776_p2), %s180_s27, 256, %s182_s30, [#allocation6], %s679_s17, %s679_s17, %s680_s18  }
  0x32   : > { %193 = sbr.rel (%p796_p1) target bundleno = 75 (0x4b), region = 28  ;;  %s195_s8 = sand.u32 (!%p796_p1), 1, %s664_s13  }
  0x33   : > { %s405_s12 = sshll.u32 (!%p796_p1), %s195_s8, 4  ;;  %s196_s22 = scalar_lea.sflag (!%p796_p1), [#allocation3], %s195_s8 }
  0x34   : > { %s199_s23 = scalar_lea.vmem (!%p796_p1), [#allocation2], %s405_s12 }
  0x37   : > { %634 = dma.done.wait (%p747_p6), %s196_s22, 256  }
  0x38   : > { %636 = vsyncadd (%p747_p6), %s196_s22, 4294967040  ;;  %s206_s28 = scalar_lea.sflag [#allocation6], %s195_s8  ;;  %s209_s5 = scalar_lea.vmem [#allocation5], %s405_s12 }
  0x39   : > { %638 = dma.done.wait (%p747_p6), %s206_s28, 256  }
  0x3a   : > { %640 = vsyncadd (%p747_p6), %s206_s28, 4294967040  ;;  %s408_s4 = sshll.u32 %s668_s14, 4  ;;  %v257_v0 = vlaneseq  ;;  %s233_s17 = sand.u32 1, %s652_s10   ;;  %v249_v6 = vld [vmem:[%s199_s23] sm:$0xff]  ;;  %v250_v7 = vld [vmem:[%s199_s23 + $0x8] sm:$0xff] }
  0x3b   : > { %v260_v1 = vstv %s408_s4  ;;  %s407_s18 = sshll.u32 %s233_s17, 3  ;;  %v251_v8 = vld [vmem:[%s209_s5] sm:$0xff]  ;;  %s410_s20 = sshll.u32 %s668_s14, 3  ;;  %v252_v9 = vld [vmem:[%s209_s5 + $0x8] sm:$0xff] }
  0x3c   : > { %v258_v2 = vshrl.u32 %v257_v0, 7  ;;  %v253_v10 = vsub.f32 %v249_v6, %v251_v8  ;;  %v254_v11 = vsub.f32 %v250_v7, %v252_v9  ;;  %s288_s30 = scalar_lea.hbm %s868_s2, %s410_s20  ;;  %s235_s6 = scalar_lea.vmem [#allocation7], %s407_s18 }
  0x3d   : > { %s290_s29 = sshll.u32 %s235_s6, 4  ;;  %s292_s3 = sshll.u32 %s288_s30, 4  ;;  %s291_s29 = int_to_ptr.vmem [resolvable:$true] %s290_s29  ;;  %s293_s3 = int_to_ptr.hbm [resolvable:$true] %s292_s3 }
  0x3e   : > { %v259_v3 = vadd.s32 8, %v258_v2  ;;  %v261_v4 = vadd.s32 %v260_v1, %v258_v2  ;;  %s278_s14 = scalar_lea.sflag [#allocation4], %s233_s17  ;;  %s583_s7 = sshra.s32 %s293_s3, 4  ;;  %s584_s7 = int_to_ptr.hbm [resolvable:$true] %s583_s7 }
  0x3f   : > { %s585_s8 = scalar_lea.hbm %s584_s7, 8  ;;  %s589_s23 = scalar_lea.hbm %s868_s2, 16 }
  0x40   : > { %v262_v5 = vadd.s32 %v260_v1, %v259_v3  ;;  %vm263_vm0 = vcmp.lt.s32.totalorder %v261_v4, 16  ;;  %p586_p6 = scmp.ne.s32.totalorder %s584_s7, %s585_s8  ;;  %p590_p4 = scmp.lt.s32.totalorder %s584_s7, %s868_s2 }
  0x41   : > { %v269_v12 = vsel %vm263_vm0, %v253_v10, 0.0  ;;  %p591_p11 = scmp.lt.s32.totalorder %s589_s23, %s585_s8 }
  0x42   : > { %vm264_vm1 = vcmp.lt.s32.totalorder %v262_v5, 16  ;;  %v271_v14 = vmul.f32 %v269_v12, %v269_v12  ;;  %p587_p2 = pnand %p586_p6, %p761_p12 }
  0x43   : > { %v270_v13 = vsel %vm264_vm1, %v254_v11, 0.0  ;;  %p592_p1 = por %p591_p11, %p590_p4 }
  0x44   : > { %v272_v15 = vmul.f32 %v270_v13, %v270_v13  ;;  %p588_p8 = pneg %p587_p2 }
  0x46   : > { %v274_v16 = vadd.f32 %v272_v15, %v271_v14  ;;  %p593_p7 = pnand %p592_p1, %p588_p8 }
  0x48   : > { %276 = vst [vmem:[%s235_s6] sm:$0xff] %v274_v16 }
  0x49   : > { %596 = shalt.err (!%p593_p7)
}
  0x4a   : > { %419 = dma.vmem_to_hbm [thread:$0]  (%p761_p12), %s291_s29, 128, %s293_s3, %s278_s14  }
  0x4b PF: > { %s304_s4 = sand.u32 1, %s648_s9   ;;  %p429_p9 = pnand %p397_p13, %p766_p0 }
  0x4c   : > { %s305_s17 = scalar_lea.sflag [#allocation4], %s304_s4 }
  0x4d   : > { %p430_p10 = pneg %p429_p9 }
  0x4f   : > { %642 = dma.done.wait (%p430_p10), %s305_s17, 128  }
  0x50   : > { %644 = vsyncadd (%p430_p10), %s305_s17, 4294967168  ;;  %s21_s16 = sadd.s32 1, %s676_s16   ;;  %s875_s9 = smov %s652_s10 }
  0x51   : > { %p18_p3 = scmp.ge.s32.totalorder %s21_s16, 4   ;;  %s876_s10 = smov %s656_s11 }
  0x52   : > { %s877_s11 = smov %s755_s24  ;;  %s878_s12 = smov %s664_s13 }
  0x53   : > { %s856_s13 = smov 0   ;;  %s879_s14 = smov %s672_s15 }
  0x54   : > { %s880_s15 = smov %s882_s19  ;;  %20 = sbr.rel (!%p18_p3) target bundleno = 9 (0x9), region = 90 }
  0x59   :  { %311 = vsyncpa [#allocation3], 1 }
  0x5a   :  { %313 = vsyncpa [#allocation3 + $0x1], 1 }
  0x5b   :  { %314 = vsyncpa [#allocation6], 1 }
  0x5c   :  { %316 = vsyncpa [#allocation6 + $0x1], 1 }
  0x5d   :  { %317 = vsyncpa [#allocation4], 1 }
  0x5e   :  { %319 = vsyncpa [#allocation4 + $0x1], 1 }

</bundles_post_ra>
